<compile_context>
chip_gen: v6e
topology: v6e:2x2x1
jax: 0.10.0
libtpu: 0.0.40
codegen_flags: <defaults>
</compile_context>

<pallas_src>
import functools

import numpy as np
import jax
import jax.numpy as jnp
from jax.experimental import pallas as pl
from jax.experimental.pallas import tpu as pltpu

GRID_SIZE = 3
N_CTRL = GRID_SIZE * GRID_SIZE        # 9 TPS control points
PARAM_LEN = 4 * N_CTRL + 6            # [P_X(9), P_Y(9), W_X(9), W_Y(9), A_X(3), A_Y(3)]

_LANES = 128
_MAX_TILE_ROWS = 1024                 # 1024x128 px * 2 ch * 4 B * 2 buf = 2 MiB / block


def _tps_kernel(params_ref, out_ref, *, H, W, tile_rows):
    """params_ref: SMEM (B, PARAM_LEN); out_ref: VMEM (1, 2, tile_rows, 128)."""
    N = N_CTRL
    b = pl.program_id(0)
    t = pl.program_id(1)

    # ---- synthesize pixel coordinates in-kernel (no gx/gy DMA) ----
    row = jax.lax.broadcasted_iota(jnp.int32, (tile_rows, _LANES), 0)
    lane = jax.lax.broadcasted_iota(jnp.int32, (tile_rows, _LANES), 1)
    p = (t * tile_rows + row) * _LANES + lane            # flat pixel index = i*W + j

    # i = p // W, j = p % W without vector integer division:
    # float-reciprocal estimate + integer correction (exact for p < 2^24).
    inv_w = np.float32(1.0 / W)
    i = jnp.floor(p.astype(jnp.float32) * inv_w).astype(jnp.int32)
    for _ in range(2):
        r = p - i * W
        i = jnp.where(r < 0, i - 1, i)
        r = p - i * W
        i = jnp.where(r >= W, i + 1, i)
    j = p - i * W

    sx = np.float32(2.0 / (W - 1)) if W > 1 else np.float32(0.0)
    sy = np.float32(2.0 / (H - 1)) if H > 1 else np.float32(0.0)
    x = j.astype(jnp.float32) * sx - 1.0                 # linspace(-1, 1, W)[j]
    y = i.astype(jnp.float32) * sy - 1.0                 # linspace(-1, 1, H)[i]

    # ---- affine part (scalars hoisted once per grid step) ----
    base = 4 * N
    ax0 = params_ref[b, base + 0]
    ax1 = params_ref[b, base + 1]
    ax2 = params_ref[b, base + 2]
    ay0 = params_ref[b, base + 3]
    ay1 = params_ref[b, base + 4]
    ay2 = params_ref[b, base + 5]

    acc_x = ax0 + ax1 * x + ax2 * y
    acc_y = ay0 + ay1 * x + ay2 * y

    # ---- static unroll over the 9 control points (VPU elementwise + EUP log) ----
    for k in range(N):
        px = params_ref[b, k]
        py = params_ref[b, N + k]
        wx = params_ref[b, 2 * N + k]
        wy = params_ref[b, 3 * N + k]
        dx = x - px
        dy = y - py
        d2 = dx * dx + dy * dy
        d2 = jnp.where(d2 == 0.0, 1.0, d2)   # matches dist_squared[dist_squared==0] = 1
        u = d2 * jnp.log(d2)
        acc_x = acc_x + wx * u
        acc_y = acc_y + wy * u

    # Lane-dense (tile_rows, 128) stores -> unmasked vst.
    out_ref[0, 0, :, :] = acc_x
    out_ref[0, 1, :, :] = acc_y


def _compute_L_inverse(P_X, P_Y):
    """P_X, P_Y: (B, N) -> Li: (B, N+3, N+3). Mirrors TpsGridGen2.compute_L_inverse."""
    B, N = P_X.shape
    Xm = P_X[:, :, None]
    Ym = P_Y[:, :, None]
    d2 = (Xm - jnp.transpose(Xm, (0, 2, 1))) ** 2 + (Ym - jnp.transpose(Ym, (0, 2, 1))) ** 2
    d2 = jnp.where(d2 == 0.0, 1.0, d2)
    K = d2 * jnp.log(d2)
    O = jnp.ones((B, N, 1), jnp.float32)
    P = jnp.concatenate([O, Xm, Ym], axis=2)
    Z = jnp.zeros((B, 3, 3), jnp.float32)
    L = jnp.concatenate(
        [jnp.concatenate([K, P], axis=2),
         jnp.concatenate([jnp.transpose(P, (0, 2, 1)), Z], axis=2)], axis=1)
    return jnp.linalg.inv(L)


def _solve_tps_params(theta):
    """theta (B, 4N) -> params (B, PARAM_LEN) = [P_X, P_Y, W_X, W_Y, A_X, A_Y]."""
    N = N_CTRL
    Q_X = theta[:, :N]
    Q_Y = theta[:, N:2 * N]
    P_X = theta[:, 2 * N:3 * N]
    P_Y = theta[:, 3 * N:]
    Li = _compute_L_inverse(P_X, P_Y)
    W_X = jnp.einsum('bij,bj->bi', Li[:, :N, :N], Q_X)
    W_Y = jnp.einsum('bij,bj->bi', Li[:, :N, :N], Q_Y)
    A_X = jnp.einsum('bij,bj->bi', Li[:, N:, :N], Q_X)
    A_Y = jnp.einsum('bij,bj->bi', Li[:, N:, :N], Q_Y)
    return jnp.concatenate([P_X, P_Y, W_X, W_Y, A_X, A_Y], axis=1).astype(jnp.float32)


def tps_grid_gen2_forward(theta, out_h=16, out_w=16):
    """theta: (B, 4*N) or (B, 4*N, 1, 1) -> warped grid (B, out_h, out_w, 2)."""
    if theta.ndim == 4:
        theta = theta[:, :, 0, 0]
    theta = theta.astype(jnp.float32)
    B = theta.shape[0]

    params = _solve_tps_params(theta)                    # (B, PARAM_LEN) -> SMEM

    HW = out_h * out_w
    r_total = pl.cdiv(HW, _LANES)
    if r_total <= _MAX_TILE_ROWS:
        tile_rows = r_total                              # one pixel tile per batch
        n_tiles = 1
    else:
        tile_rows = _MAX_TILE_ROWS                       # multiple of 8 -> legal block
        n_tiles = pl.cdiv(r_total, tile_rows)
    r_pad = tile_rows * n_tiles

    kernel = functools.partial(_tps_kernel, H=out_h, W=out_w, tile_rows=tile_rows)

    out = pl.pallas_call(
        kernel,
        out_shape=jax.ShapeDtypeStruct((B, 2, r_pad, _LANES), jnp.float32),
        grid_spec=pltpu.PrefetchScalarGridSpec(
            num_scalar_prefetch=0,
            grid=(B, n_tiles),
            in_specs=[
                pl.BlockSpec(memory_space=pltpu.MemorySpace.SMEM),  # params (B, PARAM_LEN)
            ],
            out_specs=pl.BlockSpec((1, 2, tile_rows, _LANES),
                                   lambda b, t: (b, 0, t, 0)),
        ),
        compiler_params=pltpu.CompilerParams(
            dimension_semantics=("parallel", "parallel")),
    )(params)

    # Un-flatten: (B, 2, r_pad, 128) -> (B, 2, H, W) -> (B, H, W, 2).
    # TODO(synk): for very large grids, expose the channel-major (B, 2, H, W)
    # layout directly to downstream consumers to avoid this transpose pass.
    out = out.reshape(B, 2, r_pad * _LANES)[:, :, :HW].reshape(B, 2, out_h, out_w)
    return jnp.transpose(out, (0, 2, 3, 1))


def tps_grid_gen2_reference(theta, out_h=16, out_w=16):
    """Pure-JAX reference mirroring the PyTorch apply_transformation."""
    if theta.ndim == 4:
        theta = theta[:, :, 0, 0]
    theta = theta.astype(jnp.float32)
    N = N_CTRL
    Q_X = theta[:, :N]
    Q_Y = theta[:, N:2 * N]
    P_X = theta[:, 2 * N:3 * N]
    P_Y = theta[:, 3 * N:]
    Li = _compute_L_inverse(P_X, P_Y)
    W_X = jnp.einsum('bij,bj->bi', Li[:, :N, :N], Q_X)
    W_Y = jnp.einsum('bij,bj->bi', Li[:, :N, :N], Q_Y)
    A_X = jnp.einsum('bij,bj->bi', Li[:, N:, :N], Q_X)
    A_Y = jnp.einsum('bij,bj->bi', Li[:, N:, :N], Q_Y)
    gx_np, gy_np = np.meshgrid(np.linspace(-1, 1, out_w), np.linspace(-1, 1, out_h))
    x = jnp.asarray(gx_np.astype(np.float32))[None]       # (1, H, W)
    y = jnp.asarray(gy_np.astype(np.float32))[None]
    dx = x[..., None] - P_X[:, None, None, :]              # (B, H, W, N)
    dy = y[..., None] - P_Y[:, None, None, :]
    d2 = dx * dx + dy * dy
    d2 = jnp.where(d2 == 0.0, 1.0, d2)
    U = d2 * jnp.log(d2)
    px = (A_X[:, None, None, 0] + A_X[:, None, None, 1] * x + A_X[:, None, None, 2] * y
          + jnp.sum(W_X[:, None, None, :] * U, axis=-1))
    py = (A_Y[:, None, None, 0] + A_Y[:, None, None, 1] * x + A_Y[:, None, None, 2] * y
          + jnp.sum(W_Y[:, None, None, :] * U, axis=-1))
    return jnp.stack([px, py], axis=-1)


if __name__ == "__main__":
    B = 2
    OUT_H, OUT_W = 16, 16
    N = N_CTRL

    # Deterministic theta: source control points P = regular 3x3 grid + small jitter,
    # target control points Q = P + small displacement.
    key = jax.random.PRNGKey(0)
    k1, k2 = jax.random.split(key)
    base = np.linspace(-1.0, 1.0, GRID_SIZE).astype(np.float32)
    bx, by = np.meshgrid(base, base)
    base_x = jnp.asarray(bx.reshape(-1))                    # (9,)
    base_y = jnp.asarray(by.reshape(-1))                    # (9,)
    jitter = 0.05 * jax.random.normal(k1, (B, 2 * N), dtype=jnp.float32)
    disp = 0.10 * jax.random.normal(k2, (B, 2 * N), dtype=jnp.float32)
    P_X = base_x[None, :] + jitter[:, :N]
    P_Y = base_y[None, :] + jitter[:, N:]
    Q_X = P_X + disp[:, :N]
    Q_Y = P_Y + disp[:, N:]
    theta = jnp.concatenate([Q_X, Q_Y, P_X, P_Y], axis=1)   # (B, 36)

    out = tps_grid_gen2_forward(theta, OUT_H, OUT_W)
    out = jax.block_until_ready(out)

    ref = jax.block_until_ready(tps_grid_gen2_reference(theta, OUT_H, OUT_W))
    assert out.shape == (B, OUT_H, OUT_W, 2), out.shape
    # Small slack: the kernel synthesizes linspace coords as j*(2/(W-1))-1 in f32
    # and accumulates the 9-point sum serially (vs. the reference's vectorized sum).
    np.testing.assert_allclose(np.asarray(out), np.asarray(ref), rtol=1e-5, atol=2e-5)

    print("KERNEL_OK")
</pallas_src>

<mosaic_0001>
module attributes {stable_mosaic.version = 11 : i64} {
  func.func @_tps_kernel(%arg0: i32, %arg1: i32, %arg2: memref<2x42xf32, #tpu.memory_space<smem>>, %arg3: memref<1x2x2x128xf32, #tpu.memory_space<vmem>>) attributes {dimension_semantics = [#tpu.dimension_semantics<parallel>, #tpu.dimension_semantics<parallel>], iteration_bounds = array<i64: 2, 1>, scalar_prefetch = 0 : i64, scratch_operands = 0 : i64, tpu.core_type = #tpu.core_type<tc>, window_params = [{transform_indices = @transform_0, window_bounds = array<i64: 2, 42>}, {transform_indices = @transform_1, window_bounds = array<i64: 1, 2, 2, 128>}]} {
    %0 = tpu.iota {dimensions = array<i32: 0>} : vector<2x128xi32>
    %1 = tpu.iota {dimensions = array<i32: 1>} : vector<2x128xi32>
    %c2_i32 = arith.constant 2 : i32
    %2 = arith.muli %arg1, %c2_i32 : i32
    %3 = vector.broadcast %2 : i32 to vector<2x128xi32>
    %4 = arith.addi %3, %0 : vector<2x128xi32>
    %c128_i32 = arith.constant 128 : i32
    %5 = vector.broadcast %c128_i32 : i32 to vector<2x128xi32>
    %6 = arith.muli %4, %5 : vector<2x128xi32>
    %7 = arith.addi %6, %1 : vector<2x128xi32>
    %8 = arith.sitofp %7 : vector<2x128xi32> to vector<2x128xf32>
    %cst = arith.constant 6.250000e-02 : f32
    %9 = vector.broadcast %cst : f32 to vector<2x128xf32>
    %10 = arith.mulf %8, %9 : vector<2x128xf32>
    %11 = math.floor %10 : vector<2x128xf32>
    %12 = arith.fptosi %11 : vector<2x128xf32> to vector<2x128xi32>
    %c16_i32 = arith.constant 16 : i32
    %13 = vector.broadcast %c16_i32 : i32 to vector<2x128xi32>
    %14 = arith.muli %12, %13 : vector<2x128xi32>
    %15 = arith.subi %7, %14 : vector<2x128xi32>
    %c0_i32 = arith.constant 0 : i32
    %16 = vector.broadcast %c0_i32 : i32 to vector<2x128xi32>
    %17 = arith.cmpi slt, %15, %16 : vector<2x128xi32>
    %c1_i32 = arith.constant 1 : i32
    %18 = vector.broadcast %c1_i32 : i32 to vector<2x128xi32>
    %19 = arith.subi %12, %18 : vector<2x128xi32>
    %20 = arith.select %17, %19, %12 : vector<2x128xi1>, vector<2x128xi32>
    %c16_i32_0 = arith.constant 16 : i32
    %21 = vector.broadcast %c16_i32_0 : i32 to vector<2x128xi32>
    %22 = arith.muli %20, %21 : vector<2x128xi32>
    %23 = arith.subi %7, %22 : vector<2x128xi32>
    %c16_i32_1 = arith.constant 16 : i32
    %24 = vector.broadcast %c16_i32_1 : i32 to vector<2x128xi32>
    %25 = arith.cmpi sge, %23, %24 : vector<2x128xi32>
    %c1_i32_2 = arith.constant 1 : i32
    %26 = vector.broadcast %c1_i32_2 : i32 to vector<2x128xi32>
    %27 = arith.addi %20, %26 : vector<2x128xi32>
    %28 = arith.select %25, %27, %20 : vector<2x128xi1>, vector<2x128xi32>
    %c16_i32_3 = arith.constant 16 : i32
    %29 = vector.broadcast %c16_i32_3 : i32 to vector<2x128xi32>
    %30 = arith.muli %28, %29 : vector<2x128xi32>
    %31 = arith.subi %7, %30 : vector<2x128xi32>
    %c0_i32_4 = arith.constant 0 : i32
    %32 = vector.broadcast %c0_i32_4 : i32 to vector<2x128xi32>
    %33 = arith.cmpi slt, %31, %32 : vector<2x128xi32>
    %c1_i32_5 = arith.constant 1 : i32
    %34 = vector.broadcast %c1_i32_5 : i32 to vector<2x128xi32>
    %35 = arith.subi %28, %34 : vector<2x128xi32>
    %36 = arith.select %33, %35, %28 : vector<2x128xi1>, vector<2x128xi32>
    %c16_i32_6 = arith.constant 16 : i32
    %37 = vector.broadcast %c16_i32_6 : i32 to vector<2x128xi32>
    %38 = arith.muli %36, %37 : vector<2x128xi32>
    %39 = arith.subi %7, %38 : vector<2x128xi32>
    %c16_i32_7 = arith.constant 16 : i32
    %40 = vector.broadcast %c16_i32_7 : i32 to vector<2x128xi32>
    %41 = arith.cmpi sge, %39, %40 : vector<2x128xi32>
    %c1_i32_8 = arith.constant 1 : i32
    %42 = vector.broadcast %c1_i32_8 : i32 to vector<2x128xi32>
    %43 = arith.addi %36, %42 : vector<2x128xi32>
    %44 = arith.select %41, %43, %36 : vector<2x128xi1>, vector<2x128xi32>
    %c16_i32_9 = arith.constant 16 : i32
    %45 = vector.broadcast %c16_i32_9 : i32 to vector<2x128xi32>
    %46 = arith.muli %44, %45 : vector<2x128xi32>
    %47 = arith.subi %7, %46 : vector<2x128xi32>
    %48 = arith.sitofp %47 : vector<2x128xi32> to vector<2x128xf32>
    %cst_10 = arith.constant 0.13333334 : f32
    %49 = vector.broadcast %cst_10 : f32 to vector<2x128xf32>
    %50 = arith.mulf %48, %49 : vector<2x128xf32>
    %cst_11 = arith.constant 1.000000e+00 : f32
    %51 = vector.broadcast %cst_11 : f32 to vector<2x128xf32>
    %52 = arith.subf %50, %51 : vector<2x128xf32>
    %53 = arith.sitofp %44 : vector<2x128xi32> to vector<2x128xf32>
    %cst_12 = arith.constant 0.13333334 : f32
    %54 = vector.broadcast %cst_12 : f32 to vector<2x128xf32>
    %55 = arith.mulf %53, %54 : vector<2x128xf32>
    %cst_13 = arith.constant 1.000000e+00 : f32
    %56 = vector.broadcast %cst_13 : f32 to vector<2x128xf32>
    %57 = arith.subf %55, %56 : vector<2x128xf32>
    %58 = arith.index_cast %arg0 : i32 to index
    %c36 = arith.constant 36 : index
    %59 = memref.load %arg2[%58, %c36] : memref<2x42xf32, #tpu.memory_space<smem>>
    %60 = arith.index_cast %arg0 : i32 to index
    %c37 = arith.constant 37 : index
    %61 = memref.load %arg2[%60, %c37] : memref<2x42xf32, #tpu.memory_space<smem>>
    %62 = arith.index_cast %arg0 : i32 to index
    %c38 = arith.constant 38 : index
    %63 = memref.load %arg2[%62, %c38] : memref<2x42xf32, #tpu.memory_space<smem>>
    %64 = arith.index_cast %arg0 : i32 to index
    %c39 = arith.constant 39 : index
    %65 = memref.load %arg2[%64, %c39] : memref<2x42xf32, #tpu.memory_space<smem>>
    %66 = arith.index_cast %arg0 : i32 to index
    %c40 = arith.constant 40 : index
    %67 = memref.load %arg2[%66, %c40] : memref<2x42xf32, #tpu.memory_space<smem>>
    %68 = arith.index_cast %arg0 : i32 to index
    %c41 = arith.constant 41 : index
    %69 = memref.load %arg2[%68, %c41] : memref<2x42xf32, #tpu.memory_space<smem>>
    %70 = vector.broadcast %61 : f32 to vector<2x128xf32>
    %71 = arith.mulf %70, %52 : vector<2x128xf32>
    %72 = vector.broadcast %59 : f32 to vector<2x128xf32>
    %73 = arith.addf %72, %71 : vector<2x128xf32>
    %74 = vector.broadcast %63 : f32 to vector<2x128xf32>
    %75 = arith.mulf %74, %57 : vector<2x128xf32>
    %76 = arith.addf %73, %75 : vector<2x128xf32>
    %77 = vector.broadcast %67 : f32 to vector<2x128xf32>
    %78 = arith.mulf %77, %52 : vector<2x128xf32>
    %79 = vector.broadcast %65 : f32 to vector<2x128xf32>
    %80 = arith.addf %79, %78 : vector<2x128xf32>
    %81 = vector.broadcast %69 : f32 to vector<2x128xf32>
    %82 = arith.mulf %81, %57 : vector<2x128xf32>
    %83 = arith.addf %80, %82 : vector<2x128xf32>
    %84 = arith.index_cast %arg0 : i32 to index
    %c0 = arith.constant 0 : index
    %85 = memref.load %arg2[%84, %c0] : memref<2x42xf32, #tpu.memory_space<smem>>
    %86 = arith.index_cast %arg0 : i32 to index
    %c9 = arith.constant 9 : index
    %87 = memref.load %arg2[%86, %c9] : memref<2x42xf32, #tpu.memory_space<smem>>
    %88 = arith.index_cast %arg0 : i32 to index
    %c18 = arith.constant 18 : index
    %89 = memref.load %arg2[%88, %c18] : memref<2x42xf32, #tpu.memory_space<smem>>
    %90 = arith.index_cast %arg0 : i32 to index
    %c27 = arith.constant 27 : index
    %91 = memref.load %arg2[%90, %c27] : memref<2x42xf32, #tpu.memory_space<smem>>
    %92 = vector.broadcast %85 : f32 to vector<2x128xf32>
    %93 = arith.subf %52, %92 : vector<2x128xf32>
    %94 = vector.broadcast %87 : f32 to vector<2x128xf32>
    %95 = arith.subf %57, %94 : vector<2x128xf32>
    %96 = arith.mulf %93, %93 : vector<2x128xf32>
    %97 = arith.mulf %95, %95 : vector<2x128xf32>
    %98 = arith.addf %96, %97 : vector<2x128xf32>
    %cst_14 = arith.constant 0.000000e+00 : f32
    %99 = vector.broadcast %cst_14 : f32 to vector<2x128xf32>
    %100 = arith.cmpf oeq, %98, %99 : vector<2x128xf32>
    %cst_15 = arith.constant 1.000000e+00 : f32
    %101 = vector.broadcast %cst_15 : f32 to vector<2x128xf32>
    %102 = arith.select %100, %101, %98 : vector<2x128xi1>, vector<2x128xf32>
    %103 = math.log %102 : vector<2x128xf32>
    %104 = arith.mulf %102, %103 : vector<2x128xf32>
    %105 = vector.broadcast %89 : f32 to vector<2x128xf32>
    %106 = arith.mulf %105, %104 : vector<2x128xf32>
    %107 = arith.addf %76, %106 : vector<2x128xf32>
    %108 = vector.broadcast %91 : f32 to vector<2x128xf32>
    %109 = arith.mulf %108, %104 : vector<2x128xf32>
    %110 = arith.addf %83, %109 : vector<2x128xf32>
    %111 = arith.index_cast %arg0 : i32 to index
    %c1 = arith.constant 1 : index
    %112 = memref.load %arg2[%111, %c1] : memref<2x42xf32, #tpu.memory_space<smem>>
    %113 = arith.index_cast %arg0 : i32 to index
    %c10 = arith.constant 10 : index
    %114 = memref.load %arg2[%113, %c10] : memref<2x42xf32, #tpu.memory_space<smem>>
    %115 = arith.index_cast %arg0 : i32 to index
    %c19 = arith.constant 19 : index
    %116 = memref.load %arg2[%115, %c19] : memref<2x42xf32, #tpu.memory_space<smem>>
    %117 = arith.index_cast %arg0 : i32 to index
    %c28 = arith.constant 28 : index
    %118 = memref.load %arg2[%117, %c28] : memref<2x42xf32, #tpu.memory_space<smem>>
    %119 = vector.broadcast %112 : f32 to vector<2x128xf32>
    %120 = arith.subf %52, %119 : vector<2x128xf32>
    %121 = vector.broadcast %114 : f32 to vector<2x128xf32>
    %122 = arith.subf %57, %121 : vector<2x128xf32>
    %123 = arith.mulf %120, %120 : vector<2x128xf32>
    %124 = arith.mulf %122, %122 : vector<2x128xf32>
    %125 = arith.addf %123, %124 : vector<2x128xf32>
    %cst_16 = arith.constant 0.000000e+00 : f32
    %126 = vector.broadcast %cst_16 : f32 to vector<2x128xf32>
    %127 = arith.cmpf oeq, %125, %126 : vector<2x128xf32>
    %cst_17 = arith.constant 1.000000e+00 : f32
    %128 = vector.broadcast %cst_17 : f32 to vector<2x128xf32>
    %129 = arith.select %127, %128, %125 : vector<2x128xi1>, vector<2x128xf32>
    %130 = math.log %129 : vector<2x128xf32>
    %131 = arith.mulf %129, %130 : vector<2x128xf32>
    %132 = vector.broadcast %116 : f32 to vector<2x128xf32>
    %133 = arith.mulf %132, %131 : vector<2x128xf32>
    %134 = arith.addf %107, %133 : vector<2x128xf32>
    %135 = vector.broadcast %118 : f32 to vector<2x128xf32>
    %136 = arith.mulf %135, %131 : vector<2x128xf32>
    %137 = arith.addf %110, %136 : vector<2x128xf32>
    %138 = arith.index_cast %arg0 : i32 to index
    %c2 = arith.constant 2 : index
    %139 = memref.load %arg2[%138, %c2] : memref<2x42xf32, #tpu.memory_space<smem>>
    %140 = arith.index_cast %arg0 : i32 to index
    %c11 = arith.constant 11 : index
    %141 = memref.load %arg2[%140, %c11] : memref<2x42xf32, #tpu.memory_space<smem>>
    %142 = arith.index_cast %arg0 : i32 to index
    %c20 = arith.constant 20 : index
    %143 = memref.load %arg2[%142, %c20] : memref<2x42xf32, #tpu.memory_space<smem>>
    %144 = arith.index_cast %arg0 : i32 to index
    %c29 = arith.constant 29 : index
    %145 = memref.load %arg2[%144, %c29] : memref<2x42xf32, #tpu.memory_space<smem>>
    %146 = vector.broadcast %139 : f32 to vector<2x128xf32>
    %147 = arith.subf %52, %146 : vector<2x128xf32>
    %148 = vector.broadcast %141 : f32 to vector<2x128xf32>
    %149 = arith.subf %57, %148 : vector<2x128xf32>
    %150 = arith.mulf %147, %147 : vector<2x128xf32>
    %151 = arith.mulf %149, %149 : vector<2x128xf32>
    %152 = arith.addf %150, %151 : vector<2x128xf32>
    %cst_18 = arith.constant 0.000000e+00 : f32
    %153 = vector.broadcast %cst_18 : f32 to vector<2x128xf32>
    %154 = arith.cmpf oeq, %152, %153 : vector<2x128xf32>
    %cst_19 = arith.constant 1.000000e+00 : f32
    %155 = vector.broadcast %cst_19 : f32 to vector<2x128xf32>
    %156 = arith.select %154, %155, %152 : vector<2x128xi1>, vector<2x128xf32>
    %157 = math.log %156 : vector<2x128xf32>
    %158 = arith.mulf %156, %157 : vector<2x128xf32>
    %159 = vector.broadcast %143 : f32 to vector<2x128xf32>
    %160 = arith.mulf %159, %158 : vector<2x128xf32>
    %161 = arith.addf %134, %160 : vector<2x128xf32>
    %162 = vector.broadcast %145 : f32 to vector<2x128xf32>
    %163 = arith.mulf %162, %158 : vector<2x128xf32>
    %164 = arith.addf %137, %163 : vector<2x128xf32>
    %165 = arith.index_cast %arg0 : i32 to index
    %c3 = arith.constant 3 : index
    %166 = memref.load %arg2[%165, %c3] : memref<2x42xf32, #tpu.memory_space<smem>>
    %167 = arith.index_cast %arg0 : i32 to index
    %c12 = arith.constant 12 : index
    %168 = memref.load %arg2[%167, %c12] : memref<2x42xf32, #tpu.memory_space<smem>>
    %169 = arith.index_cast %arg0 : i32 to index
    %c21 = arith.constant 21 : index
    %170 = memref.load %arg2[%169, %c21] : memref<2x42xf32, #tpu.memory_space<smem>>
    %171 = arith.index_cast %arg0 : i32 to index
    %c30 = arith.constant 30 : index
    %172 = memref.load %arg2[%171, %c30] : memref<2x42xf32, #tpu.memory_space<smem>>
    %173 = vector.broadcast %166 : f32 to vector<2x128xf32>
    %174 = arith.subf %52, %173 : vector<2x128xf32>
    %175 = vector.broadcast %168 : f32 to vector<2x128xf32>
    %176 = arith.subf %57, %175 : vector<2x128xf32>
    %177 = arith.mulf %174, %174 : vector<2x128xf32>
    %178 = arith.mulf %176, %176 : vector<2x128xf32>
    %179 = arith.addf %177, %178 : vector<2x128xf32>
    %cst_20 = arith.constant 0.000000e+00 : f32
    %180 = vector.broadcast %cst_20 : f32 to vector<2x128xf32>
    %181 = arith.cmpf oeq, %179, %180 : vector<2x128xf32>
    %cst_21 = arith.constant 1.000000e+00 : f32
    %182 = vector.broadcast %cst_21 : f32 to vector<2x128xf32>
    %183 = arith.select %181, %182, %179 : vector<2x128xi1>, vector<2x128xf32>
    %184 = math.log %183 : vector<2x128xf32>
    %185 = arith.mulf %183, %184 : vector<2x128xf32>
    %186 = vector.broadcast %170 : f32 to vector<2x128xf32>
    %187 = arith.mulf %186, %185 : vector<2x128xf32>
    %188 = arith.addf %161, %187 : vector<2x128xf32>
    %189 = vector.broadcast %172 : f32 to vector<2x128xf32>
    %190 = arith.mulf %189, %185 : vector<2x128xf32>
    %191 = arith.addf %164, %190 : vector<2x128xf32>
    %192 = arith.index_cast %arg0 : i32 to index
    %c4 = arith.constant 4 : index
    %193 = memref.load %arg2[%192, %c4] : memref<2x42xf32, #tpu.memory_space<smem>>
    %194 = arith.index_cast %arg0 : i32 to index
    %c13 = arith.constant 13 : index
    %195 = memref.load %arg2[%194, %c13] : memref<2x42xf32, #tpu.memory_space<smem>>
    %196 = arith.index_cast %arg0 : i32 to index
    %c22 = arith.constant 22 : index
    %197 = memref.load %arg2[%196, %c22] : memref<2x42xf32, #tpu.memory_space<smem>>
    %198 = arith.index_cast %arg0 : i32 to index
    %c31 = arith.constant 31 : index
    %199 = memref.load %arg2[%198, %c31] : memref<2x42xf32, #tpu.memory_space<smem>>
    %200 = vector.broadcast %193 : f32 to vector<2x128xf32>
    %201 = arith.subf %52, %200 : vector<2x128xf32>
    %202 = vector.broadcast %195 : f32 to vector<2x128xf32>
    %203 = arith.subf %57, %202 : vector<2x128xf32>
    %204 = arith.mulf %201, %201 : vector<2x128xf32>
    %205 = arith.mulf %203, %203 : vector<2x128xf32>
    %206 = arith.addf %204, %205 : vector<2x128xf32>
    %cst_22 = arith.constant 0.000000e+00 : f32
    %207 = vector.broadcast %cst_22 : f32 to vector<2x128xf32>
    %208 = arith.cmpf oeq, %206, %207 : vector<2x128xf32>
    %cst_23 = arith.constant 1.000000e+00 : f32
    %209 = vector.broadcast %cst_23 : f32 to vector<2x128xf32>
    %210 = arith.select %208, %209, %206 : vector<2x128xi1>, vector<2x128xf32>
    %211 = math.log %210 : vector<2x128xf32>
    %212 = arith.mulf %210, %211 : vector<2x128xf32>
    %213 = vector.broadcast %197 : f32 to vector<2x128xf32>
    %214 = arith.mulf %213, %212 : vector<2x128xf32>
    %215 = arith.addf %188, %214 : vector<2x128xf32>
    %216 = vector.broadcast %199 : f32 to vector<2x128xf32>
    %217 = arith.mulf %216, %212 : vector<2x128xf32>
    %218 = arith.addf %191, %217 : vector<2x128xf32>
    %219 = arith.index_cast %arg0 : i32 to index
    %c5 = arith.constant 5 : index
    %220 = memref.load %arg2[%219, %c5] : memref<2x42xf32, #tpu.memory_space<smem>>
    %221 = arith.index_cast %arg0 : i32 to index
    %c14 = arith.constant 14 : index
    %222 = memref.load %arg2[%221, %c14] : memref<2x42xf32, #tpu.memory_space<smem>>
    %223 = arith.index_cast %arg0 : i32 to index
    %c23 = arith.constant 23 : index
    %224 = memref.load %arg2[%223, %c23] : memref<2x42xf32, #tpu.memory_space<smem>>
    %225 = arith.index_cast %arg0 : i32 to index
    %c32 = arith.constant 32 : index
    %226 = memref.load %arg2[%225, %c32] : memref<2x42xf32, #tpu.memory_space<smem>>
    %227 = vector.broadcast %220 : f32 to vector<2x128xf32>
    %228 = arith.subf %52, %227 : vector<2x128xf32>
    %229 = vector.broadcast %222 : f32 to vector<2x128xf32>
    %230 = arith.subf %57, %229 : vector<2x128xf32>
    %231 = arith.mulf %228, %228 : vector<2x128xf32>
    %232 = arith.mulf %230, %230 : vector<2x128xf32>
    %233 = arith.addf %231, %232 : vector<2x128xf32>
    %cst_24 = arith.constant 0.000000e+00 : f32
    %234 = vector.broadcast %cst_24 : f32 to vector<2x128xf32>
    %235 = arith.cmpf oeq, %233, %234 : vector<2x128xf32>
    %cst_25 = arith.constant 1.000000e+00 : f32
    %236 = vector.broadcast %cst_25 : f32 to vector<2x128xf32>
    %237 = arith.select %235, %236, %233 : vector<2x128xi1>, vector<2x128xf32>
    %238 = math.log %237 : vector<2x128xf32>
    %239 = arith.mulf %237, %238 : vector<2x128xf32>
    %240 = vector.broadcast %224 : f32 to vector<2x128xf32>
    %241 = arith.mulf %240, %239 : vector<2x128xf32>
    %242 = arith.addf %215, %241 : vector<2x128xf32>
    %243 = vector.broadcast %226 : f32 to vector<2x128xf32>
    %244 = arith.mulf %243, %239 : vector<2x128xf32>
    %245 = arith.addf %218, %244 : vector<2x128xf32>
    %246 = arith.index_cast %arg0 : i32 to index
    %c6 = arith.constant 6 : index
    %247 = memref.load %arg2[%246, %c6] : memref<2x42xf32, #tpu.memory_space<smem>>
    %248 = arith.index_cast %arg0 : i32 to index
    %c15 = arith.constant 15 : index
    %249 = memref.load %arg2[%248, %c15] : memref<2x42xf32, #tpu.memory_space<smem>>
    %250 = arith.index_cast %arg0 : i32 to index
    %c24 = arith.constant 24 : index
    %251 = memref.load %arg2[%250, %c24] : memref<2x42xf32, #tpu.memory_space<smem>>
    %252 = arith.index_cast %arg0 : i32 to index
    %c33 = arith.constant 33 : index
    %253 = memref.load %arg2[%252, %c33] : memref<2x42xf32, #tpu.memory_space<smem>>
    %254 = vector.broadcast %247 : f32 to vector<2x128xf32>
    %255 = arith.subf %52, %254 : vector<2x128xf32>
    %256 = vector.broadcast %249 : f32 to vector<2x128xf32>
    %257 = arith.subf %57, %256 : vector<2x128xf32>
    %258 = arith.mulf %255, %255 : vector<2x128xf32>
    %259 = arith.mulf %257, %257 : vector<2x128xf32>
    %260 = arith.addf %258, %259 : vector<2x128xf32>
    %cst_26 = arith.constant 0.000000e+00 : f32
    %261 = vector.broadcast %cst_26 : f32 to vector<2x128xf32>
    %262 = arith.cmpf oeq, %260, %261 : vector<2x128xf32>
    %cst_27 = arith.constant 1.000000e+00 : f32
    %263 = vector.broadcast %cst_27 : f32 to vector<2x128xf32>
    %264 = arith.select %262, %263, %260 : vector<2x128xi1>, vector<2x128xf32>
    %265 = math.log %264 : vector<2x128xf32>
    %266 = arith.mulf %264, %265 : vector<2x128xf32>
    %267 = vector.broadcast %251 : f32 to vector<2x128xf32>
    %268 = arith.mulf %267, %266 : vector<2x128xf32>
    %269 = arith.addf %242, %268 : vector<2x128xf32>
    %270 = vector.broadcast %253 : f32 to vector<2x128xf32>
    %271 = arith.mulf %270, %266 : vector<2x128xf32>
    %272 = arith.addf %245, %271 : vector<2x128xf32>
    %273 = arith.index_cast %arg0 : i32 to index
    %c7 = arith.constant 7 : index
    %274 = memref.load %arg2[%273, %c7] : memref<2x42xf32, #tpu.memory_space<smem>>
    %275 = arith.index_cast %arg0 : i32 to index
    %c16 = arith.constant 16 : index
    %276 = memref.load %arg2[%275, %c16] : memref<2x42xf32, #tpu.memory_space<smem>>
    %277 = arith.index_cast %arg0 : i32 to index
    %c25 = arith.constant 25 : index
    %278 = memref.load %arg2[%277, %c25] : memref<2x42xf32, #tpu.memory_space<smem>>
    %279 = arith.index_cast %arg0 : i32 to index
    %c34 = arith.constant 34 : index
    %280 = memref.load %arg2[%279, %c34] : memref<2x42xf32, #tpu.memory_space<smem>>
    %281 = vector.broadcast %274 : f32 to vector<2x128xf32>
    %282 = arith.subf %52, %281 : vector<2x128xf32>
    %283 = vector.broadcast %276 : f32 to vector<2x128xf32>
    %284 = arith.subf %57, %283 : vector<2x128xf32>
    %285 = arith.mulf %282, %282 : vector<2x128xf32>
    %286 = arith.mulf %284, %284 : vector<2x128xf32>
    %287 = arith.addf %285, %286 : vector<2x128xf32>
    %cst_28 = arith.constant 0.000000e+00 : f32
    %288 = vector.broadcast %cst_28 : f32 to vector<2x128xf32>
    %289 = arith.cmpf oeq, %287, %288 : vector<2x128xf32>
    %cst_29 = arith.constant 1.000000e+00 : f32
    %290 = vector.broadcast %cst_29 : f32 to vector<2x128xf32>
    %291 = arith.select %289, %290, %287 : vector<2x128xi1>, vector<2x128xf32>
    %292 = math.log %291 : vector<2x128xf32>
    %293 = arith.mulf %291, %292 : vector<2x128xf32>
    %294 = vector.broadcast %278 : f32 to vector<2x128xf32>
    %295 = arith.mulf %294, %293 : vector<2x128xf32>
    %296 = arith.addf %269, %295 : vector<2x128xf32>
    %297 = vector.broadcast %280 : f32 to vector<2x128xf32>
    %298 = arith.mulf %297, %293 : vector<2x128xf32>
    %299 = arith.addf %272, %298 : vector<2x128xf32>
    %300 = arith.index_cast %arg0 : i32 to index
    %c8 = arith.constant 8 : index
    %301 = memref.load %arg2[%300, %c8] : memref<2x42xf32, #tpu.memory_space<smem>>
    %302 = arith.index_cast %arg0 : i32 to index
    %c17 = arith.constant 17 : index
    %303 = memref.load %arg2[%302, %c17] : memref<2x42xf32, #tpu.memory_space<smem>>
    %304 = arith.index_cast %arg0 : i32 to index
    %c26 = arith.constant 26 : index
    %305 = memref.load %arg2[%304, %c26] : memref<2x42xf32, #tpu.memory_space<smem>>
    %306 = arith.index_cast %arg0 : i32 to index
    %c35 = arith.constant 35 : index
    %307 = memref.load %arg2[%306, %c35] : memref<2x42xf32, #tpu.memory_space<smem>>
    %308 = vector.broadcast %301 : f32 to vector<2x128xf32>
    %309 = arith.subf %52, %308 : vector<2x128xf32>
    %310 = vector.broadcast %303 : f32 to vector<2x128xf32>
    %311 = arith.subf %57, %310 : vector<2x128xf32>
    %312 = arith.mulf %309, %309 : vector<2x128xf32>
    %313 = arith.mulf %311, %311 : vector<2x128xf32>
    %314 = arith.addf %312, %313 : vector<2x128xf32>
    %cst_30 = arith.constant 0.000000e+00 : f32
    %315 = vector.broadcast %cst_30 : f32 to vector<2x128xf32>
    %316 = arith.cmpf oeq, %314, %315 : vector<2x128xf32>
    %cst_31 = arith.constant 1.000000e+00 : f32
    %317 = vector.broadcast %cst_31 : f32 to vector<2x128xf32>
    %318 = arith.select %316, %317, %314 : vector<2x128xi1>, vector<2x128xf32>
    %319 = math.log %318 : vector<2x128xf32>
    %320 = arith.mulf %318, %319 : vector<2x128xf32>
    %321 = vector.broadcast %305 : f32 to vector<2x128xf32>
    %322 = arith.mulf %321, %320 : vector<2x128xf32>
    %323 = arith.addf %296, %322 : vector<2x128xf32>
    %324 = vector.broadcast %307 : f32 to vector<2x128xf32>
    %325 = arith.mulf %324, %320 : vector<2x128xf32>
    %326 = arith.addf %299, %325 : vector<2x128xf32>
    %c0_32 = arith.constant 0 : index
    %c0_33 = arith.constant 0 : index
    %c0_34 = arith.constant 0 : index
    %c0_35 = arith.constant 0 : index
    %327 = vector.load %arg3[%c0_32, %c0_33, %c0_34, %c0_35] : memref<1x2x2x128xf32, #tpu.memory_space<vmem>>, vector<1x1x2x128xf32>
    %328 = vector.shape_cast %327 : vector<1x1x2x128xf32> to vector<2x128xf32>
    %329 = vector.shape_cast %323 : vector<2x128xf32> to vector<1x1x2x128xf32>
    tpu.vector_store %arg3[%c0_32, %c0_33, %c0_34, %c0_35], %329 {strides = array<i32>} : memref<1x2x2x128xf32, #tpu.memory_space<vmem>>, vector<1x1x2x128xf32>,
    %c0_36 = arith.constant 0 : index
    %c1_37 = arith.constant 1 : index
    %c0_38 = arith.constant 0 : index
    %c0_39 = arith.constant 0 : index
    %330 = vector.load %arg3[%c0_36, %c1_37, %c0_38, %c0_39] : memref<1x2x2x128xf32, #tpu.memory_space<vmem>>, vector<1x1x2x128xf32>
    %331 = vector.shape_cast %330 : vector<1x1x2x128xf32> to vector<2x128xf32>
    %332 = vector.shape_cast %326 : vector<2x128xf32> to vector<1x1x2x128xf32>
    tpu.vector_store %arg3[%c0_36, %c1_37, %c0_38, %c0_39], %332 {strides = array<i32>} : memref<1x2x2x128xf32, #tpu.memory_space<vmem>>, vector<1x1x2x128xf32>,
    return
  }
  func.func @transform_0(%arg0: i32, %arg1: i32) -> (i32, i32) {
    %c0_i32 = arith.constant 0 : i32
    %c0_i32_0 = arith.constant 0 : i32
    %c0_i32_1 = arith.constant 0 : i32
    return %c0_i32, %c0_i32_0 : i32, i32
  }
  func.func @transform_1(%arg0: i32, %arg1: i32) -> (i32, i32, i32, i32) {
    %c0_i32 = arith.constant 0 : i32
    %c0_i32_0 = arith.constant 0 : i32
    %c0_i32_1 = arith.constant 0 : i32
    return %arg0, %c0_i32, %arg1, %c0_i32_0 : i32, i32, i32, i32
  }
}

</mosaic_0001>

<bundles_post_ra>
// kernel: tpu_custom_call.1
= control target key start
LH: loop header
LB: loop body
LE: loop exit
PB: predicated region body
PF: predicated region fallthrough
CT: control target
= control target key end

     0   :  { %s1079_s0 = inlined_call_operand.hbm [shape: f32[2,42], index: 0, kind: input, shape index: {}]   ;;  %s1080_s1 = inlined_call_operand.hbm [shape: f32[2,2,2,128], index: 1, kind: output, shape index: {}]  }
   0x1   :  { %1083 = sst [smem:[#allocation10_spill]] %s1079_s0 }
   0x2   :  { %6 = vsyncpa [#allocation4], 0 }
   0x3   :  { %7 = vsyncpa [#allocation3], 0 }
   0x4   :  { %9 = vsyncpa [#allocation3 + $0x1], 0  ;;  %s726_s6 = smov 0   ;;  %s728_s7 = smov 0  }
   0x5   :  { %s730_s8 = smov 0   ;;  %s732_s9 = smov 0  }
   0x6   :  { %s734_s10 = smov 0   ;;  %s736_s11 = smov 0  }
   0x7 LB: > { %1084 = sst [smem:[#allocation8_spill]] %s706_s10  ;;  %s512_s12 = sadd.s32 4294967295, %s710_s11   ;;  %s710_s11 = sphi %s736_s11, %s15_s11   ;;  %s706_s10 = sphi %s734_s10, %s1090_s10   ;;  %s702_s9 = sphi %s732_s9, %s1089_s9   ;;  %s698_s8 = sphi %s730_s8, %s1093_s8   ;;  %s694_s7 = sphi %s728_s7, %s1092_s7   ;;  %s690_s6 = sphi %s726_s6, %s1091_s6  }
   0x8   : > { %s513_s13 = sadd.s32 4294967294, %s710_s11   ;;  %s27_s14 = sadd.s32 1, %s706_s10 }
   0x9   : > { %s57_s15 = sadd.s32 1, %s698_s8  ;;  %p29_p0 = scmp.ge.s32.totalorder %s27_s14, 2 }
   0xa   : > { %p67_p1 = scmp.ne.s32.totalorder %s698_s8, %s694_s7  ;;  %p68_p2 = scmp.eq.s32.totalorder %s512_s12, 1 }
   0xb   : > { %p73_p3 = scmp.ne.s32.totalorder %s694_s7, %s690_s6  ;;  %s1095_s14 = smov (%p29_p0, %s27_s14), 0 }
   0xc   : > { %1085 = sst [smem:[#allocation9_spill]] %s1095_s14  ;;  %p766_p4 = por %p68_p2, %p67_p1 }
   0xd   : > { %p74_p5 = scmp.eq.s32.totalorder %s513_s13, 1  ;;  %s52_s17 = ssub.s32 %s706_s10, %s1095_s14 }
   0xe   : > { %p514_p6 = scmp.ge.s32.totalorder %s710_s11, 1  ;;  %p55_p7 = scmp.eq.s32.totalorder %s52_s17, 0 }
   0xf   : > { %p773_p8 = por %p74_p5, %p73_p3  ;;  %p81_p9 = scmp.lt.s32.totalorder %s710_s11, 3 }
  0x10   : > { %s779_s19 = scalar_select %p55_p7, %s698_s8, %s57_s15  }
  0x11   : > { %p82_p10 = pnand %p514_p6, %p81_p9  ;;  %p547_p11 = scmp.eq.s32.totalorder %s512_s12, 0 }
  0x12   : > { %s712_s20 = smov [#allocation2]   ;;  %s1088_s0 = sld [smem:[#allocation10_spill]] }
  0x13   : > { %p539_p12 = pneg %p82_p10 }
  0x14   : > { %105 = sbr.rel (%p82_p10) target bundleno = 140 (0x8c), region = 24 }
  0x15   : > { %p540_p13 = pnand %p547_p11, %p539_p12 }
  0x18   : > { %542 = dma.hbm_to_smem (!%p540_p13), %s1088_s0, 32, %s712_s20, [#allocation4]  }
  0x19   : > { %681 = dma.done.wait (%p547_p11), [#allocation4], 32  }
  0x1a   : > { %683 = vsyncadd (%p547_p11), [#allocation4], 4294967264 }
  0x1b   : > { %111 = sfence }
  0x1c   : > { %v121_v0 = vlaneseq  ;;  %s785_s23 = sshll.u32 %s702_s9, 7 }
  0x1d   : > { %s165_s24 = sadd.s32 37, %s785_s23  ;;  %s171_s25 = sadd.s32 40, %s785_s23 }
  0x1e   : > { %v122_v1 = vshrl.u32 %v121_v0, 7  ;;  %v124_v2 = vand.u32 127, %v121_v0  ;;  %s789_s26 = sld [smem:[#allocation2 + %s165_s24]]  ;;  %s190_s27 = sadd.s32 9, %s785_s23 }
  0x1f   : > { %s792_s28 = sld [smem:[#allocation2 + %s171_s25]]  ;;  %s214_s29 = sadd.s32 1, %s785_s23 }
  0x20   : > { %v128_v3 = vmul.u32 128, %v122_v1  ;;  %s796_s30 = sld [smem:[#allocation2 + %s785_s23]]  ;;  %s216_s2 = sadd.s32 10, %s785_s23 }
  0x21   : > { %s799_s3 = sld [smem:[#allocation2 + %s190_s27]]  ;;  %s240_s4 = sadd.s32 2, %s785_s23 }
  0x22   : > { %v129_v4 = vadd.s32 %v128_v3, %v124_v2  ;;  %s802_s5 = sld [smem:[#allocation2 + %s214_s29]]  ;;  %s242_s12 = sadd.s32 11, %s785_s23 }
  0x23   : > { %s805_s13 = sld [smem:[#allocation2 + %s216_s2]]  ;;  %s266_s15 = sadd.s32 3, %s785_s23 }
  0x24   : > { %v130_v5 = vcvt.s32.f32 %v129_v4  ;;  %s808_s17 = sld [smem:[#allocation2 + %s240_s4]]  ;;  %s268_s20 = sadd.s32 12, %s785_s23  ;;  %v175_v30 = vstv %s789_s26 }
  0x25   : > { %s811_s21 = sld [smem:[#allocation2 + %s242_s12]]  ;;  %s292_s22 = sadd.s32 4, %s785_s23  ;;  %v182_v31 = vstv %s792_s28 }
  0x26   : > { %v131_v6 = vmul.f32 0.0625, %v130_v5  ;;  %s814_s24 = sld [smem:[#allocation2 + %s266_s15]]  ;;  %s294_s25 = sadd.s32 13, %s785_s23  ;;  %v196_v39 = vstv %s796_s30 }
  0x27   : > { %s817_s27 = sld [smem:[#allocation2 + %s268_s20]]  ;;  %s318_s29 = sadd.s32 5, %s785_s23  ;;  %v198_v32 = vstv %s799_s3 }
  0x28   : > { %v132_v7 = vfloor.f32 %v131_v6  ;;  %s820_s2 = sld [smem:[#allocation2 + %s292_s22]]  ;;  %s320_s4 = sadd.s32 14, %s785_s23  ;;  %v222_v40 = vstv %s802_s5 }
  0x29   : > { %s823_s0 = sld [smem:[#allocation2 + %s294_s25]]  ;;  %s344_s12 = sadd.s32 6, %s785_s23  ;;  %v224_v33 = vstv %s805_s13 }
  0x2a   : > { %v531_v8 = vtrunc.f32 %v132_v7  ;;  %s826_s15 = sld [smem:[#allocation2 + %s318_s29]]  ;;  %s346_s14 = sadd.s32 15, %s785_s23  ;;  %v248_v41 = vstv %s808_s17 }
  0x2b   : > { %s829_s20 = sld [smem:[#allocation2 + %s320_s4]]  ;;  %s370_s10 = sadd.s32 7, %s785_s23  ;;  %v250_v34 = vstv %s811_s21 }
  0x2c   : > { %v532_v9 = vcvt.f32.s32 %v531_v8  ;;  %s831_s22 = sld [smem:[#allocation2 + %s344_s12]]  ;;  %s372_s29 = sadd.s32 16, %s785_s23  ;;  %v274_v42 = vstv %s814_s24 }
  0x2d   : > { %s833_s25 = sld [smem:[#allocation2 + %s346_s14]]  ;;  %s396_s4 = sadd.s32 8, %s785_s23  ;;  %v276_v37 = vstv %s817_s27 }
  0x2e   : > { %v134_v10 = vmul.u32 16, %v532_v9  ;;  %v519_v11 = vadd.s32 4294967295, %v532_v9  ;;  %s847_s14 = sld [smem:[#allocation2 + %s370_s10]]  ;;  %v300_v45 = vstv %s820_s2  ;;  %s163_s10 = sadd.s32 36, %s785_s23 }
  0x2f   : > { %v302_v38 = vstv %s823_s0  ;;  %s853_s3 = sld [smem:[#allocation2 + %s372_s29]]  ;;  %s398_s0 = sadd.s32 17, %s785_s23 }
  0x30   : > { %v135_v12 = vsub.s32 %v129_v4, %v134_v10  ;;  %s858_s13 = sld [smem:[#allocation2 + %s396_s4]]  ;;  %v326_v52 = vstv %s826_s15  ;;  %s167_s30 = sadd.s32 38, %s785_s23 }
  0x31   : > { %v328_v46 = vstv %s829_s20  ;;  %s169_s5 = sadd.s32 39, %s785_s23  ;;  %s883_s17 = sld [smem:[#allocation2 + %s398_s0]] }
  0x32   : > { %vm136_vm0 = vcmp.lt.s32.totalorder %v135_v12, 0  ;;  %v352_v53 = vstv %s831_s22  ;;  %s885_s21 = sld [smem:[#allocation2 + %s163_s10]]  ;;  %s173_s24 = sadd.s32 41, %s785_s23 }
  0x33   : > { %v138_v13 = vsel %vm136_vm0, %v519_v11, %v532_v9  ;;  %v354_v54 = vstv %s833_s25  ;;  %s889_s27 = sld [smem:[#allocation2 + %s167_s30]]  ;;  %s192_s2 = sadd.s32 18, %s785_s23 }
  0x34   : > { %v139_v14 = vmul.u32 16, %v138_v13  ;;  %v142_v15 = vadd.s32 1, %v138_v13  ;;  %v378_v6 = vstv %s847_s14  ;;  %s892_s12 = sld [smem:[#allocation2 + %s169_s5]]  ;;  %s194_s15 = sadd.s32 27, %s785_s23 }
  0x35   : > { %v380_v10 = vstv %s853_s3  ;;  %s896_s20 = sld [smem:[#allocation2 + %s173_s24]]  ;;  %s218_s22 = sadd.s32 19, %s785_s23 }
  0x36   : > { %v140_v16 = vsub.s32 %v129_v4, %v139_v14  ;;  %v404_v14 = vstv %s858_s13  ;;  %s903_s25 = sld [smem:[#allocation2 + %s192_s2]]  ;;  %s220_s29 = sadd.s32 28, %s785_s23 }
  0x37   : > { %s911_s4 = sld [smem:[#allocation2 + %s194_s15]]  ;;  %s244_s14 = sadd.s32 20, %s785_s23 }
  0x38   : > { %vm141_vm1 = vcmp.ge.s32.totalorder %v140_v16, 16  ;;  %s917_s3 = sld [smem:[#allocation2 + %s218_s22]]  ;;  %s246_s13 = sadd.s32 29, %s785_s23 }
  0x39   : > { %v143_v17 = vsel %vm141_vm1, %v142_v15, %v138_v13  ;;  %s924_s0 = sld [smem:[#allocation2 + %s220_s29]]  ;;  %s270_s10 = sadd.s32 21, %s785_s23 }
  0x3a   : > { %v144_v18 = vmul.u32 16, %v143_v17  ;;  %v520_v19 = vadd.s32 4294967295, %v143_v17  ;;  %s929_s30 = sld [smem:[#allocation2 + %s244_s14]]  ;;  %s272_s5 = sadd.s32 30, %s785_s23 }
  0x3b   : > { %s935_s24 = sld [smem:[#allocation2 + %s246_s13]]  ;;  %s296_s2 = sadd.s32 22, %s785_s23 }
  0x3c   : > { %v145_v20 = vsub.s32 %v129_v4, %v144_v18  ;;  %s298_s15 = sadd.s32 31, %s785_s23  ;;  %s946_s22 = sld [smem:[#allocation2 + %s272_s5]] }
  0x3d   : > { %s956_s29 = sld [smem:[#allocation2 + %s296_s2]]  ;;  %s322_s26 = sadd.s32 23, %s785_s23 }
  0x3e   : > { %vm146_vm2 = vcmp.lt.s32.totalorder %v145_v20, 0  ;;  %s324_s28 = sadd.s32 32, %s785_s23  ;;  %s118_s2 = sand.u32 1, %s694_s7  }
  0x3f   : > { %v148_v21 = vsel %vm146_vm2, %v520_v19, %v143_v17 }
  0x40   : > { %v149_v22 = vmul.u32 16, %v148_v21  ;;  %v152_v23 = vadd.s32 1, %v148_v21 }
  0x42   : > { %v150_v24 = vsub.s32 %v129_v4, %v149_v22 }
  0x44   : > { %vm151_vm3 = vcmp.ge.s32.totalorder %v150_v24, 16 }
  0x45   : > { %v153_v25 = vsel %vm151_vm3, %v152_v23, %v148_v21 }
  0x46   : > { %v154_v26 = vmul.u32 16, %v153_v25  ;;  %v159_v27 = vcvt.s32.f32 %v153_v25 }
  0x48   : > { %v155_v28 = vsub.s32 %v129_v4, %v154_v26  ;;  %v160_v29 = vmul.f32 0.13333334, %v159_v27 }
  0x4a   : > { %v156_v35 = vcvt.s32.f32 %v155_v28  ;;  %v843_v36 = vadd.f32 -1.0, %v160_v29 }
  0x4c   : > { %v157_v43 = vmul.f32 0.13333334, %v156_v35  ;;  %v199_v44 = vsub.f32 %v843_v36, %v198_v32  ;;  %v225_v47 = vsub.f32 %v843_v36, %v224_v33  ;;  %v251_v48 = vsub.f32 %v843_v36, %v250_v34 }
  0x4d   : > { %v277_v49 = vsub.f32 %v843_v36, %v276_v37  ;;  %v303_v50 = vsub.f32 %v843_v36, %v302_v38  ;;  %v329_v58 = vsub.f32 %v843_v36, %v328_v46  ;;  %v355_v5 = vsub.f32 %v843_v36, %v354_v54 }
  0x4e   : > { %v864_v51 = vadd.f32 -1.0, %v157_v43  ;;  %v201_v55 = vmul.f32 %v199_v44, %v199_v44  ;;  %v227_v56 = vmul.f32 %v225_v47, %v225_v47  ;;  %v253_v57 = vmul.f32 %v251_v48, %v251_v48 }
  0x4f   : > { %v279_v61 = vmul.f32 %v277_v49, %v277_v49  ;;  %v305_v62 = vmul.f32 %v303_v50, %v303_v50  ;;  %v331_v18 = vmul.f32 %v329_v58, %v329_v58  ;;  %v357_v20 = vmul.f32 %v355_v5, %v355_v5 }
  0x50   : > { %v197_v59 = vsub.f32 %v864_v51, %v196_v39  ;;  %v223_v60 = vsub.f32 %v864_v51, %v222_v40  ;;  %v249_v63 = vsub.f32 %v864_v51, %v248_v41  ;;  %v275_v0 = vsub.f32 %v864_v51, %v274_v42 }
  0x51   : > { %v301_v1 = vsub.f32 %v864_v51, %v300_v45  ;;  %v327_v2 = vsub.f32 %v864_v51, %v326_v52  ;;  %v353_v19 = vsub.f32 %v864_v51, %v352_v53  ;;  %v379_v28 = vsub.f32 %v864_v51, %v378_v6 }
  0x52   : > { %v200_v3 = vmul.f32 %v197_v59, %v197_v59  ;;  %v226_v4 = vmul.f32 %v223_v60, %v223_v60  ;;  %v252_v7 = vmul.f32 %v249_v63, %v249_v63  ;;  %v278_v8 = vmul.f32 %v275_v0, %v275_v0 }
  0x53   : > { %v304_v9 = vmul.f32 %v301_v1, %v301_v1  ;;  %v330_v13 = vmul.f32 %v327_v2, %v327_v2  ;;  %v356_v27 = vmul.f32 %v353_v19, %v353_v19  ;;  %v381_v29 = vsub.f32 %v843_v36, %v380_v10 }
  0x54   : > { %v202_v11 = vadd.f32 %v201_v55, %v200_v3  ;;  %v228_v12 = vadd.f32 %v227_v56, %v226_v4  ;;  %v254_v15 = vadd.f32 %v253_v57, %v252_v7  ;;  %v280_v16 = vadd.f32 %v279_v61, %v278_v8 }
  0x55   : > { %v306_v17 = vadd.f32 %v305_v62, %v304_v9  ;;  %v332_v26 = vadd.f32 %v331_v18, %v330_v13  ;;  %v405_v32 = vsub.f32 %v864_v51, %v404_v14  ;;  %v358_v33 = vadd.f32 %v357_v20, %v356_v27 }
  0x56   : > { %vm203_vm4 = vcmp.eq.f32.partialorder %v202_v11, 0.0  ;;  %vm229_vm5 = vcmp.eq.f32.partialorder %v228_v12, 0.0  ;;  %vm255_vm6 = vcmp.eq.f32.partialorder %v254_v15, 0.0  ;;  %vm281_vm7 = vcmp.eq.f32.partialorder %v280_v16, 0.0 }
  0x57   : > { %v898_v21 = vsel %vm203_vm4, 1.0, %v202_v11  ;;  %v901_v22 = vsel %vm229_vm5, 1.0, %v228_v12  ;;  %v907_v23 = vsel %vm255_vm6, 1.0, %v254_v15  ;;  %v909_v24 = vsel %vm281_vm7, 1.0, %v280_v16 }
  0x58   : > { %601 = vlog2.f32 %v898_v21  ;;  %vm307_vm8 = vcmp.eq.f32.partialorder %v306_v17, 0.0  ;;  %vm333_vm9 = vcmp.eq.f32.partialorder %v332_v26, 0.0  ;;  %v406_v34 = vstv %s883_s17  ;;  %s940_s17 = sld [smem:[#allocation2 + %s270_s10]] }
  0x59   : > { %603 = vlog2.f32 %v901_v22  ;;  %v915_v25 = vsel %vm307_vm8, 1.0, %v306_v17  ;;  %v933_v35 = vsel %vm333_vm9, 1.0, %v332_v26  ;;  %v382_v37 = vmul.f32 %v379_v28, %v379_v28 }
  0x5a   : > { %605 = vlog2.f32 %v907_v23  ;;  %v383_v38 = vmul.f32 %v381_v29, %v381_v29  ;;  %vm359_vm10 = vcmp.eq.f32.partialorder %v358_v33, 0.0  ;;  %v407_v39 = vsub.f32 %v843_v36, %v406_v34 }
  0x5b   : > { %607 = vlog2.f32 %v909_v24  ;;  %v408_v40 = vmul.f32 %v405_v32, %v405_v32  ;;  %v943_v41 = vsel %vm359_vm10, 1.0, %v358_v33  ;;  %v177_v43 = vstv %s885_s21  ;;  %s960_s21 = sld [smem:[#allocation2 + %s298_s15]]  ;;  %s530_s15 = sshll.u32 %s702_s9, 6 }
  0x5c   : > { %609 = vlog2.f32 %v915_v25  ;;  %v384_v42 = vadd.f32 %v383_v38, %v382_v37  ;;  %v409_v44 = vmul.f32 %v407_v39, %v407_v39  ;;  %v176_v45 = vmul.f32 %v864_v51, %v175_v30  ;;  %s1034_s9 = scalar_lea.sflag [#allocation3], %s118_s2 }
  0x5d   : > { %611 = vlog2.f32 %v933_v35  ;;  %v179_v46 = vstv %s889_s27  ;;  %v183_v47 = vmul.f32 %v864_v51, %v182_v31  ;;  %v184_v48 = vstv %s892_s12  ;;  %s348_s27 = sadd.s32 24, %s785_s23  ;;  %s978_s12 = sld [smem:[#allocation2 + %s322_s26]] }
  0x5e   : > { %613 = vlog2.f32 %v943_v41  ;;  %vm385_vm11 = vcmp.eq.f32.partialorder %v384_v42, 0.0  ;;  %v186_v49 = vstv %s896_s20  ;;  %v410_v52 = vadd.f32 %v409_v44, %v408_v40  ;;  %s350_s20 = sadd.s32 33, %s785_s23  ;;  %s988_s14 = sld [smem:[#allocation2 + %s348_s27]] }
  0x5f   : > { %v962_v50 = vsel %vm385_vm11, 1.0, %v384_v42  ;;  %v180_v30 = vmul.f32 %v843_v36, %v179_v46  ;;  %v178_v31 = vadd.f32 %v177_v43, %v176_v45  ;;  %v185_v51 = vadd.f32 %v184_v48, %v183_v47  ;;  %s994_s13 = sld [smem:[#allocation2 + %s350_s20]] }
  0x60   : > { %615 = vlog2.f32 %v962_v50  ;;  %vm411_vm12 = vcmp.eq.f32.partialorder %v410_v52, 0.0  ;;  %v187_v53 = vmul.f32 %v843_v36, %v186_v49  ;;  %v208_v56 = vstv %s903_s25  ;;  %s984_s25 = sld [smem:[#allocation2 + %s324_s28]]  ;;  %s1028_s28 = scalar_lea.hbm %s1080_s1, %s530_s15 }
  0x61   : > { %v969_v54 = vsel %vm411_vm12, 1.0, %v410_v52  ;;  %v211_v57 = vstv %s911_s4  ;;  %v234_v60 = vstv %s917_s3  ;;  %v237_v61 = vstv %s924_s0  ;;  %s374_s4 = sadd.s32 25, %s785_s23  ;;  %s376_s3 = sadd.s32 34, %s785_s23 }
  0x62   : > { %617 = vlog2.f32 %v969_v54  ;;  %v260_v62 = vstv %s929_s30  ;;  %v263_v0 = vstv %s935_s24  ;;  %v286_v1 = vstv %s940_s17  ;;  %s400_s0 = sadd.s32 26, %s785_s23  ;;  %s998_s10 = sld [smem:[#allocation2 + %s374_s4]] }
  0x63   : > { %v289_v2 = vstv %s946_s22  ;;  %v181_v4 = vadd.f32 %v180_v30, %v178_v31  ;;  %v188_v5 = vadd.f32 %v187_v53, %v185_v51  ;;  %v312_v11 = vstv %s956_s29  ;;  %s402_s30 = sadd.s32 35, %s785_s23  ;;  %s1002_s5 = sld [smem:[#allocation2 + %s376_s3]] }
  0x64   : > { %v315_v12 = vstv %s960_s21  ;;  %s1004_s24 = sld [smem:[#allocation2 + %s400_s0]]  ;;  %v338_v43 = vstv %s978_s12  ;;  %v364_v48 = vstv %s988_s14  ;;  %s518_s17 = sshll.u32 %s118_s2, 2 }
  0x65   : > { %v602_v55 = vpop.eup %601  ;;  %s1007_s23 = sld [smem:[#allocation2 + %s402_s30]]  ;;  %v367_v49 = vstv %s994_s13  ;;  %s120_s22 = scalar_lea.vmem [#allocation5], %s518_s17 }
  0x66   : > { %v604_v58 = vpop.eup %603  ;;  %v206_v59 = vmul.f32 0.6931472, %v602_v55  ;;  %v341_v44 = vstv %s984_s25  ;;  %s440_s29 = sshll.u32 %s120_s22, 4  ;;  %s713_s12 = smov [#allocation5]   ;;  %s1030_s29 = int_to_ptr.vmem [resolvable:$true] %s440_s29 }
  0x67   : > { %v606_v36 = vpop.eup %605  ;;  %v232_v63 = vmul.f32 0.6931472, %v604_v58  ;;  %s630_s27 = scalar_lea.vmem %s1030_s29, 64  ;;  %s634_s20 = sshll.u32 %s713_s12, 4  ;;  %s635_s20 = int_to_ptr.vmem [resolvable:$false] %s634_s20 }
  0x68   : > { %v608_v3 = vpop.eup %607  ;;  %v207_v6 = vmul.f32 %v206_v59, %v898_v21  ;;  %v258_v7 = vmul.f32 0.6931472, %v606_v36  ;;  %v390_v55 = vstv %s998_s10  ;;  %p631_p0 = scmp.ne.s32.totalorder %s1030_s29, %s630_s27  ;;  %s636_s25 = scalar_lea.vmem %s635_s20, 128 }
  0x69   : > { %v610_v8 = vpop.eup %609  ;;  %v233_v9 = vmul.f32 %v232_v63, %v901_v22  ;;  %v284_v10 = vmul.f32 0.6931472, %v608_v3  ;;  %p637_p3 = scmp.lt.s32.totalorder %s1030_s29, %s635_s20  ;;  %p638_p5 = scmp.lt.s32.totalorder %s636_s25, %s630_s27 }
  0x6a   : > { %v612_v13 = vpop.eup %611  ;;  %v209_v14 = vmul.f32 %v208_v56, %v207_v6  ;;  %v212_v15 = vmul.f32 %v211_v57, %v207_v6  ;;  %v259_v16 = vmul.f32 %v258_v7, %v907_v23  ;;  %v310_v17 = vmul.f32 0.6931472, %v610_v8  ;;  %p632_p1 = pnand %p631_p0, %p766_p4 }
  0x6b   : > { %v235_v18 = vmul.f32 %v234_v60, %v233_v9  ;;  %v238_v19 = vmul.f32 %v237_v61, %v233_v9  ;;  %v285_v20 = vmul.f32 %v284_v10, %v909_v24  ;;  %v336_v21 = vmul.f32 0.6931472, %v612_v13  ;;  %v614_v22 = vpop.eup %613  ;;  %p639_p6 = por %p638_p5, %p637_p3 }
  0x6c   : > { %v210_v26 = vadd.f32 %v209_v14, %v181_v4  ;;  %v213_v27 = vadd.f32 %v212_v15, %v188_v5  ;;  %v261_v28 = vmul.f32 %v260_v62, %v259_v16  ;;  %v264_v29 = vmul.f32 %v263_v0, %v259_v16  ;;  %p633_p2 = pneg %p632_p1 }
  0x6d   : > { %v287_v23 = vmul.f32 %v286_v1, %v285_v20  ;;  %v290_v32 = vmul.f32 %v289_v2, %v285_v20  ;;  %v311_v33 = vmul.f32 %v310_v17, %v915_v25  ;;  %v337_v37 = vmul.f32 %v336_v21, %v933_v35  ;;  %v616_v39 = vpop.eup %615 }
  0x6e   : > { %v236_v24 = vadd.f32 %v235_v18, %v210_v26  ;;  %v239_v34 = vadd.f32 %v238_v19, %v213_v27  ;;  %v362_v38 = vmul.f32 0.6931472, %v614_v22  ;;  %v388_v47 = vmul.f32 0.6931472, %v616_v39  ;;  %p640_p7 = pnand %p639_p6, %p633_p2 }
  0x6f   : > { %v313_v40 = vmul.f32 %v312_v11, %v311_v33  ;;  %v316_v42 = vmul.f32 %v315_v12, %v311_v33  ;;  %v618_v52 = vpop.eup %617  ;;  %v339_v31 = vmul.f32 %v338_v43, %v337_v37  ;;  %v342_v51 = vmul.f32 %v341_v44, %v337_v37 }
  0x70   : > { %v262_v45 = vadd.f32 %v261_v28, %v236_v24  ;;  %v265_v25 = vadd.f32 %v264_v29, %v239_v34  ;;  %v363_v46 = vmul.f32 %v362_v38, %v943_v41  ;;  %v389_v53 = vmul.f32 %v388_v47, %v962_v50 }
  0x71   : > { %v393_v56 = vstv %s1002_s5  ;;  %v414_v57 = vmul.f32 0.6931472, %v618_v52  ;;  %v416_v62 = vstv %s1004_s24  ;;  %v419_v36 = vstv %s1007_s23 }
  0x72   : > { %v288_v35 = vadd.f32 %v287_v23, %v262_v45  ;;  %v291_v30 = vadd.f32 %v290_v32, %v265_v25  ;;  %v365_v59 = vmul.f32 %v364_v48, %v363_v46  ;;  %v368_v60 = vmul.f32 %v367_v49, %v363_v46 }
  0x73   : > { %v415_v61 = vmul.f32 %v414_v57, %v969_v54  ;;  %v391_v1 = vmul.f32 %v390_v55, %v389_v53  ;;  %v394_v2 = vmul.f32 %v393_v56, %v389_v53 }
  0x74   : > { %v314_v58 = vadd.f32 %v313_v40, %v288_v35  ;;  %v317_v41 = vadd.f32 %v316_v42, %v291_v30 }
  0x75   : > { %v417_v50 = vmul.f32 %v416_v62, %v415_v61  ;;  %v420_v5 = vmul.f32 %v419_v36, %v415_v61 }
  0x76   : > { %v340_v63 = vadd.f32 %v339_v31, %v314_v58  ;;  %v343_v0 = vadd.f32 %v342_v51, %v317_v41 }
  0x78   : > { %v366_v3 = vadd.f32 %v365_v59, %v340_v63  ;;  %v369_v4 = vadd.f32 %v368_v60, %v343_v0 }
  0x7a   : > { %v392_v6 = vadd.f32 %v391_v1, %v366_v3  ;;  %v395_v7 = vadd.f32 %v394_v2, %v369_v4 }
  0x7c   : > { %v418_v54 = vadd.f32 %v417_v50, %v392_v6  ;;  %v421_v8 = vadd.f32 %v420_v5, %v395_v7 }
  0x7e   : > { %422 = vst [vmem:[%s120_s22] sm:$0x3] %v418_v54  ;;  %524 = vst [vmem:[%s120_s22 + $0x2] sm:$0x3] %v421_v8 }
  0x7f   : > { %643 = shalt.err (!%p640_p7)
}
  0x80   : > { %s644_s4 = scalar_lea.hbm %s1028_s28, 64  ;;  %s648_s13 = scalar_lea.hbm %s1080_s1, 128 }
  0x81   : > { %p645_p9 = scmp.ne.s32.totalorder %s1028_s28, %s644_s4  ;;  %p649_p12 = scmp.lt.s32.totalorder %s1028_s28, %s1080_s1 }
  0x82   : > { %p650_p13 = scmp.lt.s32.totalorder %s648_s13, %s644_s4 }
  0x83   : > { %p646_p10 = pnand %p645_p9, %p766_p4 }
  0x84   : > { %p651_p0 = por %p650_p13, %p649_p12 }
  0x85   : > { %p647_p11 = pneg %p646_p10 }
  0x87   : > { %p652_p1 = pnand %p651_p0, %p647_p11 }
  0x89   : > { %655 = shalt.err (!%p652_p1)
}
  0x8a   : > { %s714_s30 = smov 32   ;;  %s715_s5 = smov 2  }
  0x8b   : > { %537 = dma.vmem_to_hbm [thread:$0]  (%p766_p4), %s1030_s29, 64, %s1028_s28, %s1034_s9, %s714_s30, %s714_s30, %s715_s5  }
  0x8c PF: > { %p549_p2 = scmp.ge.s32.totalorder %s710_s11, 2  ;;  %s455_s24 = sand.u32 1, %s690_s6  }
  0x8d   : > { %s456_s23 = scalar_lea.sflag [#allocation3], %s455_s24 }
  0x8e   : > { %p544_p3 = pnand %p549_p2, %p773_p8 }
  0x90   : > { %p545_p5 = pneg %p544_p3 }
  0x92   : > { %685 = dma.done.wait (%p545_p5), %s456_s23, 64  }
  0x93   : > { %687 = vsyncadd (%p545_p5), %s456_s23, 4294967232  ;;  %s15_s11 = sadd.s32 1, %s710_s11   ;;  %s1089_s9 = sld [smem:[#allocation8_spill]] }
  0x94   : > { %p12_p6 = scmp.ge.s32.totalorder %s15_s11, 4   ;;  %s1090_s10 = sld [smem:[#allocation9_spill]] }
  0x95   : > { %s1091_s6 = smov %s694_s7  ;;  %s1092_s7 = smov %s698_s8 }
  0x96   : > { %s1093_s8 = smov %s779_s19  ;;  %14 = sbr.rel (!%p12_p6) target bundleno = 7 (0x7), region = 62 }
  0x9b   :  { %461 = vsyncpa [#allocation3], 1 }
  0x9c   :  { %463 = vsyncpa [#allocation3 + $0x1], 1 }
  0x9d   :  { %464 = vsyncpa [#allocation4], 1 }
  0x9e   :  { %466 = vsyncpa [#allocation4 + $0x1], 1 }

</bundles_post_ra>
